<compile_context>
chip_gen: v5e
topology: v5e:2x2
jax: 0.10.0
libtpu: 0.0.40
codegen_flags: <defaults>
</compile_context>

<pallas_src>
import jax
import jax.numpy as jnp
from jax.experimental import pallas as pl
from jax.experimental.pallas import tpu as pltpu


# ----------------------------------------------------------------------------
# Kernel
# ----------------------------------------------------------------------------
def _reward_kernel(obs_ref, ac_ref, w_eff_ref, b_eff_ref, a_ref, bvec_ref,
                   w_ref, out_ref):
    """Natural [batch, feature] layout.

    Shapes seen by the kernel:
      obs   [TB, D]     ac    [TB, A]
      w_eff [D, N]      b_eff [1, N]
      A     [N, N]      bvec  [1, N]
      w     [1, 1] (SMEM)
      out   [TB, 1]
    """
    x = obs_ref[...]                                                  # [TB, D]

    # Collapsed MLP (one matmul) + ReLU output activation.
    y = jnp.dot(x, w_eff_ref[...], preferred_element_type=jnp.float32)
    y = jnp.maximum(y + b_eff_ref[...], 0.0)                          # [TB, N]

    # Quadratic head.
    z = jnp.dot(y, a_ref[...], preferred_element_type=jnp.float32)
    z = z + bvec_ref[...]                                             # [TB, N]
    z_sq = jnp.sum(z * z, axis=-1, keepdims=True)                     # [TB, 1]

    ac = ac_ref[...].astype(jnp.float32)                              # [TB, A]
    u_sq = jnp.sum(ac * ac, axis=-1, keepdims=True)                   # [TB, 1]

    w_scalar = w_ref[0, 0]                                            # SMEM scalar
    out_ref[...] = -(z_sq + w_scalar * u_sq)                          # reward = -cost


# ----------------------------------------------------------------------------
# Wrapper
# ----------------------------------------------------------------------------
def _round_up(x, m):
    return ((x + m - 1) // m) * m


def _collapse_mlp(params):
    """Fold the identity-activation hidden chain + output Linear into one
    effective (W_eff [ob_dim, N], b_eff [1, N]).  Exact because the hidden
    activation is identity."""
    if params["hidden"]:
        ob_dim = params["hidden"][0][0].shape[0]
    else:
        ob_dim = params["Wout"].shape[0]
    W_eff = jnp.eye(ob_dim, dtype=jnp.float32)
    b_eff = jnp.zeros((1, ob_dim), dtype=jnp.float32)
    for (W, b) in params["hidden"]:
        b_eff = b_eff @ W + b.reshape(1, -1)
        W_eff = W_eff @ W
    b_eff = b_eff @ params["Wout"] + params["bout"].reshape(1, -1)
    W_eff = W_eff @ params["Wout"]
    return W_eff, b_eff


def mlp_reward_forward(observation, action, params, *, tile_b=4096,
                       stream_dtype=jnp.float32):
    """reward[b] = -( |mlp(obs[b]) @ A + b|^2 + w * |action[b]|^2 )"""
    observation = observation.astype(stream_dtype)
    action = action.astype(stream_dtype)
    B, ob_dim = observation.shape
    ac_dim = action.shape[1]

    # ---- wrapper-level algebra: collapse the identity hidden chain ---------
    W_eff, b_eff = _collapse_mlp(params)            # [ob_dim, N], [1, N]
    N = W_eff.shape[1]
    A = params["A"].astype(jnp.float32).reshape(N, N)
    bvec = params["b"].astype(jnp.float32).reshape(1, N)
    w = params["w"].astype(jnp.float32).reshape(1, 1)

    # ---- batch tiling (no feature padding, no transpose) -------------------
    if B <= tile_b:
        # Single grid step: whole batch in one VMEM slab, zero per-step overhead.
        b_tile = max(8, _round_up(B, 8))
        b_pad = b_tile
    else:
        # Large batch: 512-aligned tiles (fills MXU passes on all generations).
        b_tile = _round_up(min(tile_b, 32768), 512)
        b_pad = _round_up(B, b_tile)

    if b_pad != B:
        obs_p = jnp.zeros((b_pad, ob_dim), stream_dtype).at[:B].set(observation)
        ac_p = jnp.zeros((b_pad, ac_dim), stream_dtype).at[:B].set(action)
    else:
        obs_p, ac_p = observation, action            # no extra HBM pass

    grid = (b_pad // b_tile,)
    resident = lambda i: (0, 0)   # constant block -> weights stay VMEM-resident
    streamed = lambda i: (i, 0)   # per-tile batch slab (natural layout)

    # Only raise the scoped-VMEM limit when very large tiles demand it
    # (v5e default scoped limit is 16 MiB).
    itemsize = jnp.dtype(stream_dtype).itemsize
    vmem_est = (2 * b_tile * ((ob_dim + ac_dim) * itemsize + 4)     # dbl-buffered I/O
                + 4 * b_tile * N * 4)                               # y/z intermediates
    compiler_kwargs = dict(dimension_semantics=("parallel",))
    if vmem_est > 12 * 1024 * 1024:
        compiler_kwargs["vmem_limit_bytes"] = min(64 << 20,
                                                  max(32 << 20, 2 * vmem_est))

    out = pl.pallas_call(
        _reward_kernel,
        out_shape=jax.ShapeDtypeStruct((b_pad, 1), jnp.float32),
        grid=grid,
        in_specs=[
            pl.BlockSpec((b_tile, ob_dim), streamed),                # obs  [TB, D]
            pl.BlockSpec((b_tile, ac_dim), streamed),                # ac   [TB, A]
            pl.BlockSpec((ob_dim, N), resident),                     # W_eff
            pl.BlockSpec((1, N), resident),                          # b_eff
            pl.BlockSpec((N, N), resident),                          # A
            pl.BlockSpec((1, N), resident),                          # b
            pl.BlockSpec(memory_space=pltpu.MemorySpace.SMEM),       # scalar w
        ],
        out_specs=pl.BlockSpec((b_tile, 1), streamed),               # [TB, 1]
        compiler_params=pltpu.CompilerParams(**compiler_kwargs),
    )(obs_p, ac_p, W_eff, b_eff, A, bvec, w)

    return out[:B, 0]                                # [B]


# ----------------------------------------------------------------------------
# Params + pure-JAX reference (module semantics, uncollapsed)
# ----------------------------------------------------------------------------
def init_params(key, ob_dim, ac_dim, n_layers, size, output_size):
    keys = jax.random.split(key, 2 * (n_layers + 1))
    hidden = []
    in_dim = ob_dim
    ki = 0
    for _ in range(n_layers):
        W = jax.random.normal(keys[ki], (in_dim, size), jnp.float32) * 0.1
        b = jax.random.normal(keys[ki + 1], (size,), jnp.float32) * 0.1
        hidden.append((W, b))
        in_dim = size
        ki += 2
    Wout = jax.random.normal(keys[ki], (in_dim, output_size), jnp.float32) * 0.1
    bout = jax.random.normal(keys[ki + 1], (output_size,), jnp.float32) * 0.1
    # A, b, w are initialized to ones in the PyTorch module.
    A = jnp.ones((output_size, output_size), jnp.float32)
    bvec = jnp.ones((output_size,), jnp.float32)
    w = jnp.ones((1,), jnp.float32)
    return {"hidden": hidden, "Wout": Wout, "bout": bout, "A": A, "b": bvec, "w": w}


def reference_forward(observation, action, params):
    h = observation
    for (W, b) in params["hidden"]:
        h = h @ W + b                                 # identity activation
    y = jnp.maximum(h @ params["Wout"] + params["bout"], 0.0)   # relu output
    z = y @ params["A"] + params["b"]
    cost = jnp.sum(z * z, -1) + params["w"][0] * jnp.sum(action * action, -1)
    return -cost


# ----------------------------------------------------------------------------
if __name__ == "__main__":
    key = jax.random.PRNGKey(0)
    kp, ko, ka, ko2, ka2 = jax.random.split(key, 5)

    ob_dim, ac_dim = 16, 4
    n_layers, size, output_size = 2, 32, 8
    params = init_params(kp, ob_dim, ac_dim, n_layers, size, output_size)

    # Case 1: small ragged batch -> single grid step, minimal padding (300->304).
    B1 = 300
    obs1 = jax.random.normal(ko, (B1, ob_dim), jnp.float32)
    ac1 = jax.random.normal(ka, (B1, ac_dim), jnp.float32)
    r1 = jax.block_until_ready(mlp_reward_forward(obs1, ac1, params))
    ref1 = reference_forward(obs1, ac1, params)
    assert r1.shape == (B1,)
    # Tolerance allows for TPU default matmul precision + the (algebraically
    # exact) hidden-layer collapse reassociation.
    assert jnp.allclose(r1, ref1, atol=2e-2, rtol=2e-2), (
        float(jnp.max(jnp.abs(r1 - ref1))))

    # Case 2: larger batch with a small tile -> multi-step batch-tiled grid.
    B2 = 1000
    obs2 = jax.random.normal(ko2, (B2, ob_dim), jnp.float32)
    ac2 = jax.random.normal(ka2, (B2, ac_dim), jnp.float32)
    r2 = jax.block_until_ready(mlp_reward_forward(obs2, ac2, params, tile_b=512))
    ref2 = reference_forward(obs2, ac2, params)
    assert r2.shape == (B2,)
    assert jnp.allclose(r2, ref2, atol=2e-2, rtol=2e-2), (
        float(jnp.max(jnp.abs(r2 - ref2))))

    print("KERNEL_OK")
</pallas_src>

<mosaic_0001>
module attributes {stable_mosaic.version = 11 : i64} {
  func.func @_reward_kernel(%arg0: i32, %arg1: memref<304x16xf32, #tpu.memory_space<vmem>>, %arg2: memref<304x4xf32, #tpu.memory_space<vmem>>, %arg3: memref<16x8xf32, #tpu.memory_space<vmem>>, %arg4: memref<1x8xf32, #tpu.memory_space<vmem>>, %arg5: memref<8x8xf32, #tpu.memory_space<vmem>>, %arg6: memref<1x8xf32, #tpu.memory_space<vmem>>, %arg7: memref<1x1xf32, #tpu.memory_space<smem>>, %arg8: memref<304x1xf32, #tpu.memory_space<vmem>>) attributes {dimension_semantics = [#tpu.dimension_semantics<parallel>], iteration_bounds = array<i64: 1>, scalar_prefetch = 0 : i64, scratch_operands = 0 : i64, tpu.core_type = #tpu.core_type<tc>, window_params = [{transform_indices = @transform_0, window_bounds = array<i64: 304, 16>}, {transform_indices = @transform_1, window_bounds = array<i64: 304, 4>}, {pipeline_mode = #tpu.pipeline_mode<synchronous>, transform_indices = @transform_2, window_bounds = array<i64: 16, 8>}, {pipeline_mode = #tpu.pipeline_mode<synchronous>, transform_indices = @transform_3, window_bounds = array<i64: 1, 8>}, {pipeline_mode = #tpu.pipeline_mode<synchronous>, transform_indices = @transform_4, window_bounds = array<i64: 8, 8>}, {pipeline_mode = #tpu.pipeline_mode<synchronous>, transform_indices = @transform_5, window_bounds = array<i64: 1, 8>}, {transform_indices = @transform_6, window_bounds = array<i64: 1, 1>}, {transform_indices = @transform_7, window_bounds = array<i64: 304, 1>}]} {
    %c0 = arith.constant 0 : index
    %c0_0 = arith.constant 0 : index
    %0 = vector.load %arg1[%c0, %c0_0] : memref<304x16xf32, #tpu.memory_space<vmem>>, vector<304x16xf32>
    %c0_1 = arith.constant 0 : index
    %c0_2 = arith.constant 0 : index
    %1 = vector.load %arg3[%c0_1, %c0_2] : memref<16x8xf32, #tpu.memory_space<vmem>>, vector<16x8xf32>
    %cst = arith.constant dense<0.000000e+00> : vector<304x8xf32>
    %2 = tpu.matmul %0, %1, %cst {dimension_numbers = #tpu.dot_dimension_numbers<[1], [0], [0], [1], [0, 0, 1, 1], [], []>} : vector<304x16xf32>, vector<16x8xf32>, vector<304x8xf32> -> vector<304x8xf32>
    %c0_3 = arith.constant 0 : index
    %c0_4 = arith.constant 0 : index
    %3 = vector.load %arg4[%c0_3, %c0_4] : memref<1x8xf32, #tpu.memory_space<vmem>>, vector<1x8xf32>
    %4 = vector.broadcast %3 : vector<1x8xf32> to vector<304x8xf32>
    %5 = arith.addf %2, %4 : vector<304x8xf32>
    %cst_5 = arith.constant 0.000000e+00 : f32
    %6 = vector.broadcast %cst_5 : f32 to vector<304x8xf32>
    %7 = arith.maximumf %5, %6 : vector<304x8xf32>
    %c0_6 = arith.constant 0 : index
    %c0_7 = arith.constant 0 : index
    %8 = vector.load %arg5[%c0_6, %c0_7] : memref<8x8xf32, #tpu.memory_space<vmem>>, vector<8x8xf32>
    %cst_8 = arith.constant dense<0.000000e+00> : vector<304x8xf32>
    %9 = tpu.matmul %7, %8, %cst_8 {dimension_numbers = #tpu.dot_dimension_numbers<[1], [0], [0], [1], [0, 0, 1, 1], [], []>} : vector<304x8xf32>, vector<8x8xf32>, vector<304x8xf32> -> vector<304x8xf32>
    %c0_9 = arith.constant 0 : index
    %c0_10 = arith.constant 0 : index
    %10 = vector.load %arg6[%c0_9, %c0_10] : memref<1x8xf32, #tpu.memory_space<vmem>>, vector<1x8xf32>
    %11 = vector.broadcast %10 : vector<1x8xf32> to vector<304x8xf32>
    %12 = arith.addf %9, %11 : vector<304x8xf32>
    %13 = arith.mulf %12, %12 : vector<304x8xf32>
    %cst_11 = arith.constant dense<0.000000e+00> : vector<304xf32>
    %14 = vector.multi_reduction <add>, %13, %cst_11 [1] : vector<304x8xf32> to vector<304xf32>
    %15 = vector.shape_cast %14 : vector<304xf32> to vector<304x1xf32>
    %c0_12 = arith.constant 0 : index
    %c0_13 = arith.constant 0 : index
    %16 = vector.load %arg2[%c0_12, %c0_13] : memref<304x4xf32, #tpu.memory_space<vmem>>, vector<304x4xf32>
    %17 = arith.mulf %16, %16 : vector<304x4xf32>
    %cst_14 = arith.constant dense<0.000000e+00> : vector<304xf32>
    %18 = vector.multi_reduction <add>, %17, %cst_14 [1] : vector<304x4xf32> to vector<304xf32>
    %19 = vector.shape_cast %18 : vector<304xf32> to vector<304x1xf32>
    %c0_15 = arith.constant 0 : index
    %c0_16 = arith.constant 0 : index
    %20 = memref.load %arg7[%c0_15, %c0_16] : memref<1x1xf32, #tpu.memory_space<smem>>
    %21 = vector.broadcast %20 : f32 to vector<304x1xf32>
    %22 = arith.mulf %21, %19 : vector<304x1xf32>
    %23 = arith.addf %15, %22 : vector<304x1xf32>
    %cst_17 = arith.constant 0.000000e+00 : f32
    %24 = vector.broadcast %cst_17 : f32 to vector<304x1xf32>
    %25 = arith.subf %24, %23 : vector<304x1xf32>
    %c0_18 = arith.constant 0 : index
    %c0_19 = arith.constant 0 : index
    %26 = vector.load %arg8[%c0_18, %c0_19] : memref<304x1xf32, #tpu.memory_space<vmem>>, vector<304x1xf32>
    tpu.vector_store %arg8[%c0_18, %c0_19], %25 {strides = array<i32>} : memref<304x1xf32, #tpu.memory_space<vmem>>, vector<304x1xf32>,
    return
  }
  func.func @transform_0(%arg0: i32) -> (i32, i32) {
    %c0_i32 = arith.constant 0 : i32
    %c0_i32_0 = arith.constant 0 : i32
    return %arg0, %c0_i32 : i32, i32
  }
  func.func @transform_1(%arg0: i32) -> (i32, i32) {
    %c0_i32 = arith.constant 0 : i32
    %c0_i32_0 = arith.constant 0 : i32
    return %arg0, %c0_i32 : i32, i32
  }
  func.func @transform_2(%arg0: i32) -> (i32, i32) {
    %c0_i32 = arith.constant 0 : i32
    %c0_i32_0 = arith.constant 0 : i32
    %c0_i32_1 = arith.constant 0 : i32
    return %c0_i32, %c0_i32_0 : i32, i32
  }
  func.func @transform_3(%arg0: i32) -> (i32, i32) {
    %c0_i32 = arith.constant 0 : i32
    %c0_i32_0 = arith.constant 0 : i32
    %c0_i32_1 = arith.constant 0 : i32
    return %c0_i32, %c0_i32_0 : i32, i32
  }
  func.func @transform_4(%arg0: i32) -> (i32, i32) {
    %c0_i32 = arith.constant 0 : i32
    %c0_i32_0 = arith.constant 0 : i32
    %c0_i32_1 = arith.constant 0 : i32
    return %c0_i32, %c0_i32_0 : i32, i32
  }
  func.func @transform_5(%arg0: i32) -> (i32, i32) {
    %c0_i32 = arith.constant 0 : i32
    %c0_i32_0 = arith.constant 0 : i32
    %c0_i32_1 = arith.constant 0 : i32
    return %c0_i32, %c0_i32_0 : i32, i32
  }
  func.func @transform_6(%arg0: i32) -> (i32, i32) {
    %c0_i32 = arith.constant 0 : i32
    %c0_i32_0 = arith.constant 0 : i32
    %c0_i32_1 = arith.constant 0 : i32
    return %c0_i32, %c0_i32_0 : i32, i32
  }
  func.func @transform_7(%arg0: i32) -> (i32, i32) {
    %c0_i32 = arith.constant 0 : i32
    %c0_i32_0 = arith.constant 0 : i32
    return %arg0, %c0_i32 : i32, i32
  }
}

</mosaic_0001>

<bundles_post_ra>
// kernel: tpu_custom_call.1
= control target key start
LH: loop header
LB: loop body
LE: loop exit
PB: predicated region body
PF: predicated region fallthrough
CT: control target
= control target key end

     0   :  { %vm71_vm0 = vcmask 130048   ;;  %vm360_vm1 = vcmask 64512   ;;  %vm834_vm2 = vcmask 31744   ;;  %vm1065_vm3 = vcmask 7168   ;;  %s2007_s2 = inlined_call_operand.vmem [shape: f32[16,8], index: 2, kind: input, shape index: {}]   ;;  %s2008_s0 = inlined_call_operand.vmem [shape: f32[304,16], index: 0, kind: input, shape index: {}]   ;;  %s2009_s3 = inlined_call_operand.vmem [shape: f32[1,8], index: 3, kind: input, shape index: {}]   ;;  %s2010_s4 = inlined_call_operand.vmem [shape: f32[8,8], index: 4, kind: input, shape index: {}]   ;;  %s2011_s5 = inlined_call_operand.vmem [shape: f32[1,8], index: 5, kind: input, shape index: {}]   ;;  %s2012_s1 = inlined_call_operand.vmem [shape: f32[304,4], index: 1, kind: input, shape index: {}]   ;;  %s2013_s6 = inlined_call_operand.<no memory space> [shape: f32[1,1], index: 6, kind: input, shape index: {}]   ;;  %s2014_s7 = inlined_call_operand.vmem [shape: f32[304,1], index: 7, kind: output, shape index: {}]  }
   0x1   :  { %v66_v0 = vld [vmem:[%s2007_s2 + $0x8] sm:$0xff]  ;;  %v65_v1 = vld [vmem:[%s2007_s2] sm:$0xff]  ;;  %v46_v3 = vld [vmem:[%s2008_s0 + $0x98] sm:$0xff] }
   0x2   :  { %200 = vmatpush.msra.mxu0 %v66_v0  ;;  %1184 = vmatpush.msra.mxu2 %v66_v0  ;;  %v27_v2 = vld [vmem:[%s2008_s0] sm:$0xff]  ;;  %v28_v4 = vld [vmem:[%s2008_s0 + $0x8] sm:$0xff]  ;;  %v29_v6 = vld [vmem:[%s2008_s0 + $0x10] sm:$0xff] }
   0x3   :  { %v47_v5 = vld [vmem:[%s2008_s0 + $0xa0] sm:$0xff]  ;;  %v48_v7 = vld [vmem:[%s2008_s0 + $0xa8] sm:$0xff]  ;;  %v30_v8 = vld [vmem:[%s2008_s0 + $0x18] sm:$0xff] }
   0x4   :  { %201 = vmatpush.msra.mxu0 %v65_v1  ;;  %1185 = vmatpush.msra.mxu2 %v65_v1  ;;  %v49_v9 = vld [vmem:[%s2008_s0 + $0xb0] sm:$0xff]  ;;  %v31_v10 = vld [vmem:[%s2008_s0 + $0x20] sm:$0xff]  ;;  %v50_v11 = vld [vmem:[%s2008_s0 + $0xb8] sm:$0xff] }
   0x5   :  { %1108 = vmatmul.msk.f32.vlgmr.msra.gmra.mxu0 %vm71_vm0, %v27_v2  ;;  %1127 = vmatmul.msk.f32.vlgmr.msra.gmra.mxu2 %vm71_vm0, %v46_v3  ;;  %v32_v12 = vld [vmem:[%s2008_s0 + $0x28] sm:$0xff]  ;;  %v51_v13 = vld [vmem:[%s2008_s0 + $0xc0] sm:$0xff]  ;;  %v33_v14 = vld [vmem:[%s2008_s0 + $0x30] sm:$0xff] }
   0x6   :  { %v52_v15 = vld [vmem:[%s2008_s0 + $0xc8] sm:$0xff]  ;;  %v34_v16 = vld [vmem:[%s2008_s0 + $0x38] sm:$0xff]  ;;  %v53_v17 = vld [vmem:[%s2008_s0 + $0xd0] sm:$0xff] }
   0x7   :  { %v35_v18 = vld [vmem:[%s2008_s0 + $0x40] sm:$0xff]  ;;  %v54_v19 = vld [vmem:[%s2008_s0 + $0xd8] sm:$0xff]  ;;  %v36_v20 = vld [vmem:[%s2008_s0 + $0x48] sm:$0xff] }
   0x8   :  { %v55_v21 = vld [vmem:[%s2008_s0 + $0xe0] sm:$0xff]  ;;  %v37_v22 = vld [vmem:[%s2008_s0 + $0x50] sm:$0xff]  ;;  %v56_v23 = vld [vmem:[%s2008_s0 + $0xe8] sm:$0xff] }
   0x9   :  { %v38_v24 = vld [vmem:[%s2008_s0 + $0x58] sm:$0xff]  ;;  %v57_v25 = vld [vmem:[%s2008_s0 + $0xf0] sm:$0xff]  ;;  %v39_v26 = vld [vmem:[%s2008_s0 + $0x60] sm:$0xff] }
   0xa   :  { %v58_v27 = vld [vmem:[%s2008_s0 + $0xf8] sm:$0xff]  ;;  %v355_v28 = vld [vmem:[%s2010_s4] sm:$0xff]  ;;  %v40_v29 = vld [vmem:[%s2008_s0 + $0x68] sm:$0xff] }
   0xb   :  { %490 = vmatpush.msra.mxu1 %v355_v28  ;;  %1186 = vmatpush.msra.mxu3 %v355_v28  ;;  %v59_v30 = vld [vmem:[%s2008_s0 + $0x100] sm:$0xff]  ;;  %v41_v31 = vld [vmem:[%s2008_s0 + $0x70] sm:$0xff]  ;;  %v60_v32 = vld [vmem:[%s2008_s0 + $0x108] sm:$0xff] }
   0xc   :  { %v42_v33 = vld [vmem:[%s2008_s0 + $0x78] sm:$0xff]  ;;  %v61_v34 = vld [vmem:[%s2008_s0 + $0x110] sm:$0xff]  ;;  %v1369_v35 = vld [vmem:[%s2009_s3] ss:$0 sm:$0xff] }
   0xd   :  { %1109 = vmatmul.msk.f32.gmra.mxu0 %vm71_vm0, %v28_v4  ;;  %1128 = vmatmul.msk.f32.gmra.mxu2 %vm71_vm0, %v47_v5  ;;  %v43_v37 = vld [vmem:[%s2008_s0 + $0x80] sm:$0xff]  ;;  %v62_v38 = vld [vmem:[%s2008_s0 + $0x118] sm:$0xff]  ;;  %v759_v41 = vld [vmem:[%s2012_s1 + $0x8] sm:$0xff] }
   0xe   :  { %v797_v42 = vmul.f32 %v759_v41, %v759_v41  ;;  %v44_v46 = vld [vmem:[%s2008_s0 + $0x88] sm:$0xff]  ;;  %v63_v47 = vld [vmem:[%s2008_s0 + $0x120] sm:$0xff]  ;;  %v45_v56 = vld [vmem:[%s2008_s0 + $0x90] sm:$0xff] }
   0xf   :  { %v762_v50 = vld [vmem:[%s2012_s1 + $0x20] sm:$0xff]  ;;  %v64_v59 = vld [vmem:[%s2008_s0 + $0x128] sm:$0xff]  ;;  %v765_v61 = vld [vmem:[%s2012_s1 + $0x38] sm:$0xff] }
  0x10   :  { %v838_v44 = vsel %vm834_vm2, %v797_v42, 0.0  ;;  %v800_v51 = vmul.f32 %v762_v50, %v762_v50  ;;  %v803_v62 = vmul.f32 %v765_v61, %v765_v61 }
  0x11   :  { %839 = vadd.xlane.f32.xlu0 %v838_v44 }
  0x12   :  { %v847_v54 = vsel %vm834_vm2, %v800_v51, 0.0  ;;  %v856_v1 = vsel %vm834_vm2, %v803_v62, 0.0 }
  0x15   :  { %1110 = vmatmul.msk.f32.gmra.mxu0 %vm71_vm0, %v29_v6  ;;  %1129 = vmatmul.msk.f32.gmra.mxu2 %vm71_vm0, %v48_v7  ;;  %v760_v6 = vld [vmem:[%s2012_s1 + $0x10] sm:$0xff] }
  0x16   :  { %v768_v7 = vld [vmem:[%s2012_s1 + $0x50] sm:$0xff] }
  0x19   :  { %848 = vadd.xlane.f32.xlu0 %v847_v54  ;;  %v777_v54 = vld [vmem:[%s2012_s1 + $0x98] sm:$0xff] }
  0x1d   :  { %1111 = vmatmul.msk.f32.gmra.mxu0 %vm71_vm0, %v30_v8  ;;  %1130 = vmatmul.msk.f32.gmra.mxu2 %vm71_vm0, %v49_v9  ;;  %v758_v8 = vld [vmem:[%s2012_s1] sm:$0xff]  ;;  %v798_v9 = vmul.f32 %v760_v6, %v760_v6 }
  0x1e   :  { %v770_v6 = vld [vmem:[%s2012_s1 + $0x60] sm:$0xff] }
  0x21   :  { %857 = vadd.xlane.f32.xlu0 %v856_v1 }
  0x25   :  { %1112 = vmatmul.msk.f32.gmra.mxu0 %vm71_vm0, %v31_v10  ;;  %1131 = vmatmul.msk.f32.gmra.mxu2 %vm71_vm0, %v50_v11  ;;  %v806_v10 = vmul.f32 %v768_v7, %v768_v7  ;;  %v796_v11 = vmul.f32 %v758_v8, %v758_v8 }
  0x2d   :  { %1113 = vmatmul.msk.f32.gmra.mxu0 %vm71_vm0, %v32_v12  ;;  %1132 = vmatmul.msk.f32.gmra.mxu2 %vm71_vm0, %v51_v13 }
  0x35   :  { %1114 = vmatmul.msk.f32.gmra.mxu0 %vm71_vm0, %v33_v14  ;;  %1133 = vmatmul.msk.f32.gmra.mxu2 %vm71_vm0, %v52_v15  ;;  %v841_v14 = vsel %vm834_vm2, %v798_v9, 0.0  ;;  %v865_v15 = vsel %vm834_vm2, %v806_v10, 0.0  ;;  %v808_v9 = vmul.f32 %v770_v6, %v770_v6 }
  0x36   :  { %842 = vadd.xlane.f32.xlu1 %v841_v14  ;;  %866 = vadd.xlane.f32.xlu0 %v865_v15 }
  0x37   :  { %v871_v14 = vsel %vm834_vm2, %v808_v9, 0.0 }
  0x3d   :  { %1115 = vmatmul.msk.f32.gmra.mxu0 %vm71_vm0, %v34_v16  ;;  %1134 = vmatmul.msk.f32.gmra.mxu2 %vm71_vm0, %v53_v17  ;;  %v835_v16 = vsel %vm834_vm2, %v796_v11, 0.0 }
  0x3e   :  { %836 = vadd.xlane.f32.xlu2 %v835_v16 }
  0x45   :  { %1116 = vmatmul.msk.f32.gmra.mxu0 %vm71_vm0, %v35_v18  ;;  %1135 = vmatmul.msk.f32.gmra.mxu2 %vm71_vm0, %v54_v19 }
  0x4d   :  { %1117 = vmatmul.msk.f32.gmra.mxu0 %vm71_vm0, %v36_v20  ;;  %1136 = vmatmul.msk.f32.gmra.mxu2 %vm71_vm0, %v55_v21  ;;  %v763_v21 = vld [vmem:[%s2012_s1 + $0x28] sm:$0xff] }
  0x55   :  { %1118 = vmatmul.msk.f32.gmra.mxu0 %vm71_vm0, %v37_v22  ;;  %1137 = vmatmul.msk.f32.gmra.mxu2 %vm71_vm0, %v56_v23  ;;  %v771_v22 = vld [vmem:[%s2012_s1 + $0x68] sm:$0xff]  ;;  %v761_v23 = vld [vmem:[%s2012_s1 + $0x18] sm:$0xff] }
  0x5d   :  { %1119 = vmatmul.msk.f32.gmra.mxu0 %vm71_vm0, %v38_v24  ;;  %1138 = vmatmul.msk.f32.gmra.mxu2 %vm71_vm0, %v57_v25  ;;  %v801_v24 = vmul.f32 %v763_v21, %v763_v21  ;;  %v809_v25 = vmul.f32 %v771_v22, %v771_v22  ;;  %v773_v21 = vld [vmem:[%s2012_s1 + $0x78] sm:$0xff] }
  0x65   :  { %1120 = vmatmul.msk.f32.gmra.mxu0 %vm71_vm0, %v39_v26  ;;  %1139 = vmatmul.msk.f32.gmra.mxu2 %vm71_vm0, %v58_v27  ;;  %v799_v26 = vmul.f32 %v761_v23, %v761_v23 }
  0x6d   :  { %1121 = vmatmul.msk.f32.gmra.mxu0 %vm71_vm0, %v40_v29  ;;  %1140 = vmatmul.msk.f32.gmra.mxu2 %vm71_vm0, %v59_v30  ;;  %v850_v29 = vsel %vm834_vm2, %v801_v24, 0.0  ;;  %v874_v30 = vsel %vm834_vm2, %v809_v25, 0.0  ;;  %v811_v24 = vmul.f32 %v773_v21, %v773_v21 }
  0x6e   :  { %851 = vadd.xlane.f32.xlu1 %v850_v29  ;;  %875 = vadd.xlane.f32.xlu0 %v874_v30 }
  0x6f   :  { %v880_v29 = vsel %vm834_vm2, %v811_v24, 0.0 }
  0x75   :  { %1122 = vmatmul.msk.f32.gmra.mxu0 %vm71_vm0, %v41_v31  ;;  %1141 = vmatmul.msk.f32.gmra.mxu2 %vm71_vm0, %v60_v32  ;;  %v844_v31 = vsel %vm834_vm2, %v799_v26, 0.0 }
  0x76   :  { %845 = vadd.xlane.f32.xlu2 %v844_v31 }
  0x7d   :  { %1123 = vmatmul.msk.f32.gmra.mxu0 %vm71_vm0, %v42_v33  ;;  %1142 = vmatmul.msk.f32.gmra.mxu2 %vm71_vm0, %v61_v34 }
  0x82   :  { %v203_v36 = vpop.f32.mrf.mxu0 }
  0x83   :  { %v204_v39 = vadd.f32 %v1369_v35, %v203_v36 }
  0x85   :  { %v317_v40 = vmax.f32 %v204_v39, 0.0  ;;  %1124 = vmatmul.msk.f32.gmra.mxu0 %vm71_vm0, %v43_v37  ;;  %1143 = vmatmul.msk.f32.gmra.mxu2 %vm71_vm0, %v62_v38  ;;  %v766_v37 = vld [vmem:[%s2012_s1 + $0x40] sm:$0xff]  ;;  %v764_v39 = vld [vmem:[%s2012_s1 + $0x30] sm:$0xff] }
  0x86   :  { %v774_v38 = vld [vmem:[%s2012_s1 + $0x80] sm:$0xff]  ;;  %v802_v42 = vmul.f32 %v764_v39, %v764_v39 }
  0x87   :  { %1146 = vmatmul.msk.f32.vlgmr.msra.gmra.mxu1 %vm360_vm1, %v317_v40  ;;  %v804_v40 = vmul.f32 %v766_v37, %v766_v37  ;;  %v812_v41 = vmul.f32 %v774_v38, %v774_v38  ;;  %v776_v37 = vld [vmem:[%s2012_s1 + $0x90] sm:$0xff] }
  0x88   :  { %v1384_v43 = vpop.f32.mrf.mxu2 }
  0x8a   :  { %v206_v45 = vpop.f32.mrf.mxu0 }
  0x8b   :  { %v207_v48 = vadd.f32 %v1369_v35, %v206_v45 }
  0x8d   :  { %v318_v49 = vmax.f32 %v207_v48, 0.0  ;;  %1125 = vmatmul.msk.f32.gmra.mxu0 %vm71_vm0, %v44_v46  ;;  %1144 = vmatmul.msk.f32.gmra.mxu2 %vm71_vm0, %v63_v47  ;;  %v859_v46 = vsel %vm834_vm2, %v804_v40, 0.0  ;;  %v883_v47 = vsel %vm834_vm2, %v812_v41, 0.0  ;;  %v853_v48 = vsel %vm834_vm2, %v802_v42, 0.0 }
  0x8e   :  { %860 = vadd.xlane.f32.xlu1 %v859_v46  ;;  %884 = vadd.xlane.f32.xlu0 %v883_v47  ;;  %v814_v40 = vmul.f32 %v776_v37, %v776_v37 }
  0x8f   :  { %1147 = vmatmul.msk.f32.gmra.mxu1 %vm360_vm1, %v318_v49  ;;  %854 = vadd.xlane.f32.xlu2 %v853_v48 }
  0x90   :  { %v263_v52 = vpop.f32.mrf.mxu2  ;;  %v889_v46 = vsel %vm834_vm2, %v814_v40, 0.0 }
  0x91   :  { %v264_v53 = vadd.f32 %v1369_v35, %v263_v52 }
  0x92   :  { %v209_v55 = vpop.f32.mrf.mxu0 }
  0x93   :  { %v337_v57 = vmax.f32 %v264_v53, 0.0  ;;  %v210_v58 = vadd.f32 %v1369_v35, %v209_v55  ;;  %v769_v53 = vld [vmem:[%s2012_s1 + $0x58] sm:$0xff]  ;;  %v767_v55 = vld [vmem:[%s2012_s1 + $0x48] sm:$0xff] }
  0x95   :  { %v319_v60 = vmax.f32 %v210_v58, 0.0  ;;  %1126 = vmatmul.msk.f32.gmra.mxu0 %vm71_vm0, %v45_v56  ;;  %1166 = vmatmul.msk.f32.vlgmr.msra.gmra.mxu3 %vm360_vm1, %v337_v57  ;;  %v807_v56 = vmul.f32 %v769_v53, %v769_v53  ;;  %v815_v57 = vmul.f32 %v777_v54, %v777_v54  ;;  %v805_v58 = vmul.f32 %v767_v55, %v767_v55  ;;  %v779_v53 = vld [vmem:[%s2012_s1 + $0xa8] sm:$0xff] }
  0x96   :  { %1145 = vmatmul.msk.f32.gmra.mxu2 %vm71_vm0, %v64_v59 }
  0x97   :  { %1148 = vmatmul.msk.f32.gmra.mxu1 %vm360_vm1, %v319_v60  ;;  %v868_v61 = vsel %vm834_vm2, %v807_v56, 0.0  ;;  %v892_v62 = vsel %vm834_vm2, %v815_v57, 0.0  ;;  %v817_v56 = vmul.f32 %v779_v53, %v779_v53 }
  0x98   :  { %v266_v63 = vpop.f32.mrf.mxu2  ;;  %869 = vadd.xlane.f32.xlu1 %v868_v61  ;;  %893 = vadd.xlane.f32.xlu0 %v892_v62 }
  0x99   :  { %v267_v0 = vadd.f32 %v1369_v35, %v266_v63  ;;  %v862_v63 = vsel %vm834_vm2, %v805_v58, 0.0  ;;  %v898_v61 = vsel %vm834_vm2, %v817_v56, 0.0 }
  0x9a   :  { %v212_v2 = vpop.f32.mrf.mxu0  ;;  %863 = vadd.xlane.f32.xlu2 %v862_v63 }
  0x9b   :  { %v338_v3 = vmax.f32 %v267_v0, 0.0  ;;  %v213_v4 = vadd.f32 %v1369_v35, %v212_v2 }
  0x9d   :  { %v320_v5 = vmax.f32 %v213_v4, 0.0  ;;  %1167 = vmatmul.msk.f32.gmra.mxu3 %vm360_vm1, %v338_v3  ;;  %v772_v4 = vld [vmem:[%s2012_s1 + $0x70] sm:$0xff] }
  0x9e   :  { %v810_v7 = vmul.f32 %v772_v4, %v772_v4  ;;  %v782_v4 = vld [vmem:[%s2012_s1 + $0xc0] sm:$0xff] }
  0x9f   :  { %1149 = vmatmul.msk.f32.gmra.mxu1 %vm360_vm1, %v320_v5  ;;  %v780_v5 = vld [vmem:[%s2012_s1 + $0xb0] sm:$0xff] }
  0xa0   :  { %v269_v12 = vpop.f32.mrf.mxu2  ;;  %v818_v8 = vmul.f32 %v780_v5, %v780_v5 }
  0xa1   :  { %v270_v13 = vadd.f32 %v1369_v35, %v269_v12  ;;  %v877_v12 = vsel %vm834_vm2, %v810_v7, 0.0  ;;  %v820_v7 = vmul.f32 %v782_v4, %v782_v4 }
  0xa2   :  { %v215_v17 = vpop.f32.mrf.mxu0  ;;  %878 = vadd.xlane.f32.xlu1 %v877_v12  ;;  %872 = vadd.xlane.f32.xlu2 %v871_v14 }
  0xa3   :  { %v339_v18 = vmax.f32 %v270_v13, 0.0  ;;  %v216_v19 = vadd.f32 %v1369_v35, %v215_v17  ;;  %v901_v13 = vsel %vm834_vm2, %v818_v8, 0.0  ;;  %v907_v12 = vsel %vm834_vm2, %v820_v7, 0.0 }
  0xa4   :  { %902 = vadd.xlane.f32.xlu0 %v901_v13 }
  0xa5   :  { %v321_v20 = vmax.f32 %v216_v19, 0.0  ;;  %1168 = vmatmul.msk.f32.gmra.mxu3 %vm360_vm1, %v339_v18  ;;  %v775_v19 = vld [vmem:[%s2012_s1 + $0x88] sm:$0xff] }
  0xa6   :  { %v813_v22 = vmul.f32 %v775_v19, %v775_v19 }
  0xa7   :  { %1150 = vmatmul.msk.f32.gmra.mxu1 %vm360_vm1, %v321_v20  ;;  %v783_v20 = vld [vmem:[%s2012_s1 + $0xc8] sm:$0xff] }
  0xa8   :  { %v272_v27 = vpop.f32.mrf.mxu2  ;;  %v821_v23 = vmul.f32 %v783_v20, %v783_v20 }
  0xa9   :  { %v273_v28 = vadd.f32 %v1369_v35, %v272_v27  ;;  %v886_v27 = vsel %vm834_vm2, %v813_v22, 0.0 }
  0xaa   :  { %v218_v32 = vpop.f32.mrf.mxu0  ;;  %887 = vadd.xlane.f32.xlu1 %v886_v27  ;;  %881 = vadd.xlane.f32.xlu2 %v880_v29  ;;  %v790_v29 = vld [vmem:[%s2012_s1 + $0x100] sm:$0xff] }
  0xab   :  { %v219_v33 = vadd.f32 %v1369_v35, %v218_v32  ;;  %v340_v34 = vmax.f32 %v273_v28, 0.0  ;;  %v910_v28 = vsel %vm834_vm2, %v821_v23, 0.0 }
  0xac   :  { %911 = vadd.xlane.f32.xlu0 %v910_v28 }
  0xad   :  { %v322_v36 = vmax.f32 %v219_v33, 0.0  ;;  %1169 = vmatmul.msk.f32.gmra.mxu3 %vm360_vm1, %v340_v34  ;;  %v778_v34 = vld [vmem:[%s2012_s1 + $0xa0] sm:$0xff] }
  0xae   :  { %v816_v38 = vmul.f32 %v778_v34, %v778_v34 }
  0xaf   :  { %1151 = vmatmul.msk.f32.gmra.mxu1 %vm360_vm1, %v322_v36  ;;  %v786_v36 = vld [vmem:[%s2012_s1 + $0xe0] sm:$0xff] }
  0xb0   :  { %v275_v44 = vpop.f32.mrf.mxu2  ;;  %v824_v39 = vmul.f32 %v786_v36, %v786_v36 }
  0xb1   :  { %v276_v45 = vadd.f32 %v1369_v35, %v275_v44  ;;  %v895_v44 = vsel %vm834_vm2, %v816_v38, 0.0 }
  0xb2   :  { %v221_v49 = vpop.f32.mrf.mxu0  ;;  %896 = vadd.xlane.f32.xlu1 %v895_v44  ;;  %890 = vadd.xlane.f32.xlu2 %v889_v46 }
  0xb3   :  { %v222_v50 = vadd.f32 %v1369_v35, %v221_v49  ;;  %v341_v51 = vmax.f32 %v276_v45, 0.0  ;;  %v919_v45 = vsel %vm834_vm2, %v824_v39, 0.0 }
  0xb4   :  { %920 = vadd.xlane.f32.xlu0 %v919_v45 }
  0xb5   :  { %v323_v52 = vmax.f32 %v222_v50, 0.0  ;;  %1170 = vmatmul.msk.f32.gmra.mxu3 %vm360_vm1, %v341_v51  ;;  %v781_v51 = vld [vmem:[%s2012_s1 + $0xb8] sm:$0xff] }
  0xb6   :  { %v819_v54 = vmul.f32 %v781_v51, %v781_v51 }
  0xb7   :  { %1152 = vmatmul.msk.f32.gmra.mxu1 %vm360_vm1, %v323_v52  ;;  %v789_v52 = vld [vmem:[%s2012_s1 + $0xf8] sm:$0xff] }
  0xb8   :  { %v278_v59 = vpop.f32.mrf.mxu2  ;;  %v827_v55 = vmul.f32 %v789_v52, %v789_v52 }
  0xb9   :  { %v279_v60 = vadd.f32 %v1369_v35, %v278_v59  ;;  %v904_v59 = vsel %vm834_vm2, %v819_v54, 0.0  ;;  %v1601_v54 = vld [vmem:[%s2011_s5] ss:$0 sm:$0xff] }
  0xba   :  { %v224_v0 = vpop.f32.mrf.mxu0  ;;  %905 = vadd.xlane.f32.xlu1 %v904_v59  ;;  %899 = vadd.xlane.f32.xlu2 %v898_v61  ;;  %v1604_v59 = vpop.xlane.xlu0 %839 }
  0xbb   :  { %v225_v1 = vadd.f32 %v1369_v35, %v224_v0  ;;  %v342_v2 = vmax.f32 %v279_v60, 0.0  ;;  %v928_v60 = vsel %vm834_vm2, %v827_v55, 0.0 }
  0xbc   :  { %929 = vadd.xlane.f32.xlu0 %v928_v60 }
  0xbd   :  { %v324_v3 = vmax.f32 %v225_v1, 0.0  ;;  %1171 = vmatmul.msk.f32.gmra.mxu3 %vm360_vm1, %v342_v2  ;;  %v784_v2 = vld [vmem:[%s2012_s1 + $0xd0] sm:$0xff] }
  0xbe   :  { %v822_v5 = vmul.f32 %v784_v2, %v784_v2 }
  0xbf   :  { %1153 = vmatmul.msk.f32.gmra.mxu1 %vm360_vm1, %v324_v3  ;;  %v792_v3 = vld [vmem:[%s2012_s1 + $0x110] sm:$0xff] }
  0xc0   :  { %v281_v10 = vpop.f32.mrf.mxu2  ;;  %v830_v6 = vmul.f32 %v792_v3, %v792_v3 }
  0xc1   :  { %v282_v11 = vadd.f32 %v1369_v35, %v281_v10  ;;  %v913_v10 = vsel %vm834_vm2, %v822_v5, 0.0 }
  0xc2   :  { %v227_v15 = vpop.f32.mrf.mxu0  ;;  %914 = vadd.xlane.f32.xlu1 %v913_v10  ;;  %908 = vadd.xlane.f32.xlu2 %v907_v12 }
  0xc3   :  { %v228_v16 = vadd.f32 %v1369_v35, %v227_v15  ;;  %v343_v17 = vmax.f32 %v282_v11, 0.0  ;;  %v937_v11 = vsel %vm834_vm2, %v830_v6, 0.0 }
  0xc4   :  { %938 = vadd.xlane.f32.xlu0 %v937_v11 }
  0xc5   :  { %v325_v18 = vmax.f32 %v228_v16, 0.0  ;;  %1172 = vmatmul.msk.f32.gmra.mxu3 %vm360_vm1, %v343_v17  ;;  %v787_v17 = vld [vmem:[%s2012_s1 + $0xe8] sm:$0xff] }
  0xc6   :  { %v825_v19 = vmul.f32 %v787_v17, %v787_v17 }
  0xc7   :  { %1154 = vmatmul.msk.f32.gmra.mxu1 %vm360_vm1, %v325_v18  ;;  %v785_v18 = vld [vmem:[%s2012_s1 + $0xd8] sm:$0xff] }
  0xc8   :  { %v284_v25 = vpop.f32.mrf.mxu2  ;;  %v823_v20 = vmul.f32 %v785_v18, %v785_v18  ;;  %v922_v23 = vsel %vm834_vm2, %v825_v19, 0.0 }
  0xc9   :  { %v285_v26 = vadd.f32 %v1369_v35, %v284_v25 }
  0xca   :  { %v230_v30 = vpop.f32.mrf.mxu0  ;;  %v916_v24 = vsel %vm834_vm2, %v823_v20, 0.0  ;;  %923 = vadd.xlane.f32.xlu1 %v922_v23 }
  0xcb   :  { %v231_v31 = vadd.f32 %v1369_v35, %v230_v30  ;;  %v344_v32 = vmax.f32 %v285_v26, 0.0  ;;  %917 = vadd.xlane.f32.xlu2 %v916_v24  ;;  %v788_v30 = vld [vmem:[%s2012_s1 + $0xf0] sm:$0xff] }
  0xcd   :  { %v326_v33 = vmax.f32 %v231_v31, 0.0  ;;  %1173 = vmatmul.msk.f32.gmra.mxu3 %vm360_vm1, %v344_v32  ;;  %v828_v31 = vmul.f32 %v790_v29, %v790_v29  ;;  %v826_v32 = vmul.f32 %v788_v30, %v788_v30 }
  0xcf   :  { %1155 = vmatmul.msk.f32.gmra.mxu1 %vm360_vm1, %v326_v33  ;;  %v931_v36 = vsel %vm834_vm2, %v828_v31, 0.0  ;;  %v925_v37 = vsel %vm834_vm2, %v826_v32, 0.0 }
  0xd0   :  { %v287_v41 = vpop.f32.mrf.mxu2 }
  0xd1   :  { %v288_v42 = vadd.f32 %v1369_v35, %v287_v41 }
  0xd2   :  { %v233_v47 = vpop.f32.mrf.mxu0  ;;  %932 = vadd.xlane.f32.xlu1 %v931_v36 }
  0xd3   :  { %v234_v48 = vadd.f32 %v1369_v35, %v233_v47  ;;  %v345_v49 = vmax.f32 %v288_v42, 0.0  ;;  %926 = vadd.xlane.f32.xlu2 %v925_v37  ;;  %v791_v42 = vld [vmem:[%s2012_s1 + $0x108] sm:$0xff] }
  0xd4   :  { %v829_v44 = vmul.f32 %v791_v42, %v791_v42 }
  0xd5   :  { %v327_v50 = vmax.f32 %v234_v48, 0.0  ;;  %1174 = vmatmul.msk.f32.gmra.mxu3 %vm360_vm1, %v345_v49 }
  0xd6   :  { %v934_v47 = vsel %vm834_vm2, %v829_v44, 0.0 }
  0xd7   :  { %1156 = vmatmul.msk.f32.gmra.mxu1 %vm360_vm1, %v327_v50 }
  0xd8   :  { %v290_v57 = vpop.f32.mrf.mxu2 }
  0xd9   :  { %v291_v58 = vadd.f32 %v1369_v35, %v290_v57 }
  0xda   :  { %v236_v62 = vpop.f32.mrf.mxu0 }
  0xdb   :  { %v237_v63 = vadd.f32 %v1369_v35, %v236_v62  ;;  %v346_v0 = vmax.f32 %v291_v58, 0.0  ;;  %935 = vadd.xlane.f32.xlu2 %v934_v47 }
  0xdd   :  { %v328_v1 = vmax.f32 %v237_v63, 0.0  ;;  %1175 = vmatmul.msk.f32.gmra.mxu3 %vm360_vm1, %v346_v0 }
  0xdf   :  { %1157 = vmatmul.msk.f32.gmra.mxu1 %vm360_vm1, %v328_v1 }
  0xe0   :  { %v293_v8 = vpop.f32.mrf.mxu2 }
  0xe1   :  { %v294_v9 = vadd.f32 %v1369_v35, %v293_v8  ;;  %v1614_v8 = vpop.xlane.xlu0 %848 }
  0xe2   :  { %v239_v13 = vpop.f32.mrf.mxu0 }
  0xe3   :  { %v240_v14 = vadd.f32 %v1369_v35, %v239_v13  ;;  %v347_v15 = vmax.f32 %v294_v9, 0.0 }
  0xe5   :  { %v329_v16 = vmax.f32 %v240_v14, 0.0  ;;  %1176 = vmatmul.msk.f32.gmra.mxu3 %vm360_vm1, %v347_v15 }
  0xe7   :  { %1158 = vmatmul.msk.f32.gmra.mxu1 %vm360_vm1, %v329_v16 }
  0xe8   :  { %v296_v21 = vpop.f32.mrf.mxu2 }
  0xe9   :  { %v297_v22 = vadd.f32 %v1369_v35, %v296_v21  ;;  %v1623_v21 = vpop.xlane.xlu0 %857 }
  0xea   :  { %v242_v25 = vpop.f32.mrf.mxu0 }
  0xeb   :  { %v243_v26 = vadd.f32 %v1369_v35, %v242_v25  ;;  %v348_v27 = vmax.f32 %v297_v22, 0.0  ;;  %v261_v22 = vadd.f32 %v1369_v35, %v1384_v43 }
  0xed   :  { %v330_v28 = vmax.f32 %v243_v26, 0.0  ;;  %1177 = vmatmul.msk.f32.gmra.mxu3 %vm360_vm1, %v348_v27  ;;  %v1629_v26 = vpop.xlane.xlu2 %836  ;;  %v336_v31 = vmax.f32 %v261_v22, 0.0 }
  0xef   :  { %1159 = vmatmul.msk.f32.gmra.mxu1 %vm360_vm1, %v330_v28 }
  0xf0   :  { %v299_v33 = vpop.f32.mrf.mxu2 }
  0xf1   :  { %v300_v34 = vadd.f32 %v1369_v35, %v299_v33 }
  0xf2   :  { %v245_v38 = vpop.f32.mrf.mxu0 }
  0xf3   :  { %v246_v39 = vadd.f32 %v1369_v35, %v245_v38  ;;  %v349_v40 = vmax.f32 %v300_v34, 0.0  ;;  %v1636_v34 = vpop.xlane.xlu1 %842 }
  0xf5   :  { %v331_v41 = vmax.f32 %v246_v39, 0.0  ;;  %1178 = vmatmul.msk.f32.gmra.mxu3 %vm360_vm1, %v349_v40  ;;  %v1640_v39 = vpop.xlane.xlu0 %866  ;;  %v1642_v40 = vpop.xlane.xlu2 %845 }
  0xf7   :  { %1160 = vmatmul.msk.f32.gmra.mxu1 %vm360_vm1, %v331_v41 }
  0xf8   :  { %v302_v45 = vpop.f32.mrf.mxu2 }
  0xf9   :  { %v303_v46 = vadd.f32 %v1369_v35, %v302_v45 }
  0xfa   :  { %v248_v48 = vpop.f32.mrf.mxu0 }
  0xfb   :  { %v249_v49 = vadd.f32 %v1369_v35, %v248_v48  ;;  %v350_v50 = vmax.f32 %v303_v46, 0.0 }
  0xfd   :  { %v332_v51 = vmax.f32 %v249_v49, 0.0  ;;  %1179 = vmatmul.msk.f32.gmra.mxu3 %vm360_vm1, %v350_v50  ;;  %v1648_v49 = vpop.xlane.xlu1 %851 }
  0xff   :  { %1161 = vmatmul.msk.f32.gmra.mxu1 %vm360_vm1, %v332_v51 }
 0x100   :  { %v305_v52 = vpop.f32.mrf.mxu2 }
 0x101   :  { %v306_v53 = vadd.f32 %v1369_v35, %v305_v52 }
 0x102   :  { %v251_v55 = vpop.f32.mrf.mxu0 }
 0x103   :  { %v252_v56 = vadd.f32 %v1369_v35, %v251_v55  ;;  %v351_v57 = vmax.f32 %v306_v53, 0.0  ;;  %v1652_v55 = vpop.xlane.xlu0 %875 }
 0x104   :  { %v492_v58 = vpop.f32.mrf.mxu1 }
 0x105   :  { %v333_v60 = vmax.f32 %v252_v56, 0.0  ;;  %v493_v61 = vadd.f32 %v1601_v54, %v492_v58  ;;  %1180 = vmatmul.msk.f32.gmra.mxu3 %vm360_vm1, %v351_v57  ;;  %v1654_v56 = vpop.xlane.xlu2 %854 }
 0x107   :  { %v606_v62 = vmul.f32 %v493_v61, %v493_v61  ;;  %1162 = vmatmul.msk.f32.gmra.mxu1 %vm360_vm1, %v333_v60 }
 0x108   :  { %v308_v63 = vpop.f32.mrf.mxu2 }
 0x109   :  { %v644_v0 = vsel %vm360_vm1, %v606_v62, 0.0  ;;  %v309_v1 = vadd.f32 %v1369_v35, %v308_v63  ;;  %v1658_v63 = vpop.xlane.xlu1 %860 }
 0x10a   :  { %v254_v2 = vpop.f32.mrf.mxu0  ;;  %645 = vadd.xlane.f32.xlu0 %v644_v0 }
 0x10b   :  { %v255_v3 = vadd.f32 %v1369_v35, %v254_v2  ;;  %v352_v4 = vmax.f32 %v309_v1, 0.0 }
 0x10c   :  { %v495_v5 = vpop.f32.mrf.mxu1 }
 0x10d   :  { %v334_v6 = vmax.f32 %v255_v3, 0.0  ;;  %v496_v7 = vadd.f32 %v1601_v54, %v495_v5  ;;  %1181 = vmatmul.msk.f32.gmra.mxu3 %vm360_vm1, %v352_v4  ;;  %v1662_v4 = vpop.xlane.xlu0 %884  ;;  %v1664_v5 = vpop.xlane.xlu2 %863 }
 0x10f   :  { %v607_v9 = vmul.f32 %v496_v7, %v496_v7  ;;  %1163 = vmatmul.msk.f32.gmra.mxu1 %vm360_vm1, %v334_v6 }
 0x110   :  { %v311_v10 = vpop.f32.mrf.mxu2 }
 0x111   :  { %v647_v11 = vsel %vm360_vm1, %v607_v9, 0.0  ;;  %v312_v12 = vadd.f32 %v1369_v35, %v311_v10 }
 0x112   :  { %v257_v13 = vpop.f32.mrf.mxu0  ;;  %648 = vadd.xlane.f32.xlu0 %v647_v11 }
 0x113   :  { %v258_v14 = vadd.f32 %v1369_v35, %v257_v13  ;;  %v353_v15 = vmax.f32 %v312_v12, 0.0  ;;  %v1669_v13 = vpop.xlane.xlu1 %869 }
 0x114   :  { %v498_v16 = vpop.f32.mrf.mxu1 }
 0x115   :  { %v335_v17 = vmax.f32 %v258_v14, 0.0  ;;  %v499_v18 = vadd.f32 %v1601_v54, %v498_v16  ;;  %1182 = vmatmul.msk.f32.gmra.mxu3 %vm360_vm1, %v353_v15 }
 0x117   :  { %v608_v19 = vmul.f32 %v499_v18, %v499_v18  ;;  %1164 = vmatmul.msk.f32.gmra.mxu1 %vm360_vm1, %v335_v17 }
 0x118   :  { %v552_v20 = vpop.f32.mrf.mxu3 }
 0x119   :  { %v553_v23 = vadd.f32 %v1601_v54, %v552_v20  ;;  %v650_v24 = vsel %vm360_vm1, %v608_v19, 0.0  ;;  %v314_v25 = vpop.f32.mrf.mxu2  ;;  %v1674_v19 = vpop.xlane.xlu0 %893 }
 0x11a   :  { %651 = vadd.xlane.f32.xlu1 %v650_v24  ;;  %v315_v27 = vadd.f32 %v1369_v35, %v314_v25  ;;  %v1676_v20 = vpop.xlane.xlu2 %872 }
 0x11b   :  { %v626_v28 = vmul.f32 %v553_v23, %v553_v23 }
 0x11c   :  { %v354_v29 = vmax.f32 %v315_v27, 0.0  ;;  %v501_v30 = vpop.f32.mrf.mxu1 }
 0x11d   :  { %v502_v32 = vadd.f32 %v1601_v54, %v501_v30  ;;  %v704_v33 = vsel %vm360_vm1, %v626_v28, 0.0  ;;  %v1680_v28 = vpop.xlane.xlu1 %878 }
 0x11e   :  { %1183 = vmatmul.msk.f32.gmra.mxu3 %vm360_vm1, %v354_v29  ;;  %705 = vadd.xlane.f32.xlu2 %v704_v33 }
 0x11f   :  { %v609_v43 = vmul.f32 %v502_v32, %v502_v32  ;;  %1165 = vmatmul.msk.f32.gmra.mxu1 %vm360_vm1, %v336_v31 }
 0x120   :  { %v555_v36 = vpop.f32.mrf.mxu3 }
 0x121   :  { %v556_v37 = vadd.f32 %v1601_v54, %v555_v36  ;;  %v653_v35 = vsel %vm360_vm1, %v609_v43, 0.0  ;;  %v1684_v33 = vpop.xlane.xlu0 %902 }
 0x122   :  { %654 = vadd.xlane.f32.xlu1 %v653_v35  ;;  %v1686_v43 = vpop.xlane.xlu2 %881 }
 0x123   :  { %v627_v38 = vmul.f32 %v556_v37, %v556_v37 }
 0x124   :  { %v504_v41 = vpop.f32.mrf.mxu1 }
 0x125   :  { %v505_v42 = vadd.f32 %v1601_v54, %v504_v41  ;;  %v707_v44 = vsel %vm360_vm1, %v627_v38, 0.0 }
 0x126   :  { %708 = vadd.xlane.f32.xlu0 %v707_v44 }
 0x127   :  { %v610_v45 = vmul.f32 %v505_v42, %v505_v42 }
 0x128   :  { %v558_v46 = vpop.f32.mrf.mxu3 }
 0x129   :  { %v559_v47 = vadd.f32 %v1601_v54, %v558_v46  ;;  %v656_v48 = vsel %vm360_vm1, %v610_v45, 0.0  ;;  %v1692_v45 = vpop.xlane.xlu1 %887 }
 0x12a   :  { %657 = vadd.xlane.f32.xlu2 %v656_v48 }
 0x12b   :  { %v628_v50 = vmul.f32 %v559_v47, %v559_v47 }
 0x12c   :  { %v507_v51 = vpop.f32.mrf.mxu1 }
 0x12d   :  { %v508_v52 = vadd.f32 %v1601_v54, %v507_v51  ;;  %v710_v53 = vsel %vm360_vm1, %v628_v50, 0.0  ;;  %v1695_v50 = vpop.xlane.xlu0 %911  ;;  %v1697_v51 = vpop.xlane.xlu2 %890 }
 0x12e   :  { %711 = vadd.xlane.f32.xlu1 %v710_v53 }
 0x12f   :  { %v611_v57 = vmul.f32 %v508_v52, %v508_v52 }
 0x130   :  { %v561_v58 = vpop.f32.mrf.mxu3 }
 0x131   :  { %v659_v60 = vsel %vm360_vm1, %v611_v57, 0.0  ;;  %v562_v61 = vadd.f32 %v1601_v54, %v561_v58 }
 0x132   :  { %660 = vadd.xlane.f32.xlu2 %v659_v60 }
 0x133   :  { %v629_v62 = vmul.f32 %v562_v61, %v562_v61 }
 0x134   :  { %v510_v0 = vpop.f32.mrf.mxu1 }
 0x135   :  { %v511_v1 = vadd.f32 %v1601_v54, %v510_v0  ;;  %v713_v3 = vsel %vm360_vm1, %v629_v62, 0.0  ;;  %v1702_v62 = vpop.xlane.xlu1 %896 }
 0x137   :  { %v612_v2 = vmul.f32 %v511_v1, %v511_v1 }
 0x138   :  { %v564_v6 = vpop.f32.mrf.mxu3 }
 0x139   :  { %v662_v7 = vsel %vm360_vm1, %v612_v2, 0.0  ;;  %v565_v9 = vadd.f32 %v1601_v54, %v564_v6  ;;  %v1706_v6 = vpop.xlane.xlu0 %920 }
 0x13a   :  { %714 = vadd.xlane.f32.xlu2 %v713_v3  ;;  %663 = vadd.xlane.f32.xlu0 %v662_v7  ;;  %v1708_v7 = vpop.xlane.xlu2 %899 }
 0x13b   :  { %v630_v10 = vmul.f32 %v565_v9, %v565_v9 }
 0x13c   :  { %v513_v11 = vpop.f32.mrf.mxu1 }
 0x13d   :  { %v514_v12 = vadd.f32 %v1601_v54, %v513_v11  ;;  %v716_v15 = vsel %vm360_vm1, %v630_v10, 0.0 }
 0x13f   :  { %v613_v14 = vmul.f32 %v514_v12, %v514_v12 }
 0x140   :  { %v567_v16 = vpop.f32.mrf.mxu3 }
 0x141   :  { %v665_v17 = vsel %vm360_vm1, %v613_v14, 0.0  ;;  %v568_v18 = vadd.f32 %v1601_v54, %v567_v16  ;;  %v1713_v16 = vpop.xlane.xlu1 %905 }
 0x142   :  { %666 = vadd.xlane.f32.xlu1 %v665_v17  ;;  %717 = vadd.xlane.f32.xlu0 %v716_v15 }
 0x143   :  { %v631_v22 = vmul.f32 %v568_v18, %v568_v18 }
 0x144   :  { %v516_v23 = vpop.f32.mrf.mxu1 }
 0x145   :  { %v517_v24 = vadd.f32 %v1601_v54, %v516_v23  ;;  %v719_v27 = vsel %vm360_vm1, %v631_v22, 0.0 }
 0x147   :  { %v614_v25 = vmul.f32 %v517_v24, %v517_v24 }
 0x148   :  { %v570_v29 = vpop.f32.mrf.mxu3 }
 0x149   :  { %v668_v30 = vsel %vm360_vm1, %v614_v25, 0.0  ;;  %v571_v31 = vadd.f32 %v1601_v54, %v570_v29  ;;  %v1718_v25 = vpop.xlane.xlu0 %929 }
 0x14a   :  { %669 = vadd.xlane.f32.xlu2 %v668_v30  ;;  %720 = vadd.xlane.f32.xlu1 %v719_v27  ;;  %v1720_v27 = vpop.xlane.xlu2 %908 }
 0x14b   :  { %v632_v32 = vmul.f32 %v571_v31, %v571_v31 }
 0x14c   :  { %v519_v36 = vpop.f32.mrf.mxu1 }
 0x14d   :  { %v520_v37 = vadd.f32 %v1601_v54, %v519_v36  ;;  %v722_v38 = vsel %vm360_vm1, %v632_v32, 0.0 }
 0x14f   :  { %v615_v35 = vmul.f32 %v520_v37, %v520_v37  ;;  %v1724_v37 = vpop.xlane.xlu1 %914 }
 0x150   :  { %v573_v41 = vpop.f32.mrf.mxu3 }
 0x151   :  { %v671_v42 = vsel %vm360_vm1, %v615_v35, 0.0  ;;  %v574_v44 = vadd.f32 %v1601_v54, %v573_v41 }
 0x152   :  { %723 = vadd.xlane.f32.xlu2 %v722_v38  ;;  %672 = vadd.xlane.f32.xlu0 %v671_v42 }
 0x153   :  { %v633_v46 = vmul.f32 %v574_v44, %v574_v44  ;;  %v1728_v44 = vpop.xlane.xlu0 %938 }
 0x154   :  { %v522_v47 = vpop.f32.mrf.mxu1 }
 0x155   :  { %v523_v48 = vadd.f32 %v1601_v54, %v522_v47  ;;  %v725_v53 = vsel %vm360_vm1, %v633_v46, 0.0  ;;  %v1730_v46 = vpop.xlane.xlu2 %917 }
 0x157   :  { %v616_v52 = vmul.f32 %v523_v48, %v523_v48 }
 0x158   :  { %v576_v57 = vpop.f32.mrf.mxu3 }
 0x159   :  { %v674_v58 = vsel %vm360_vm1, %v616_v52, 0.0  ;;  %v577_v60 = vadd.f32 %v1601_v54, %v576_v57 }
 0x15a   :  { %675 = vadd.xlane.f32.xlu1 %v674_v58  ;;  %726 = vadd.xlane.f32.xlu0 %v725_v53 }
 0x15b   :  { %v634_v61 = vmul.f32 %v577_v60, %v577_v60 }
 0x15c   :  { %v525_v0 = vpop.f32.mrf.mxu1 }
 0x15d   :  { %v526_v1 = vadd.f32 %v1601_v54, %v525_v0  ;;  %v728_v3 = vsel %vm360_vm1, %v634_v61, 0.0  ;;  %v1736_v61 = vpop.xlane.xlu1 %923  ;;  %v1741_v0 = vstv %s2013_s6 }
 0x15f   :  { %v617_v2 = vmul.f32 %v526_v1, %v526_v1 }
 0x160   :  { %v579_v9 = vpop.f32.mrf.mxu3 }
 0x161   :  { %v677_v10 = vsel %vm360_vm1, %v617_v2, 0.0  ;;  %v580_v11 = vadd.f32 %v1601_v54, %v579_v9  ;;  %v951_v2 = vmul.f32 %v1741_v0, %v1629_v26 }
 0x162   :  { %678 = vadd.xlane.f32.xlu2 %v677_v10  ;;  %729 = vadd.xlane.f32.xlu1 %v728_v3 }
 0x163   :  { %v635_v12 = vmul.f32 %v580_v11, %v580_v11  ;;  %v1746_v11 = vpop.xlane.xlu2 %926 }
 0x164   :  { %v528_v14 = vpop.f32.mrf.mxu1 }
 0x165   :  { %v529_v15 = vadd.f32 %v1601_v54, %v528_v14  ;;  %v731_v18 = vsel %vm360_vm1, %v635_v12, 0.0 }
 0x167   :  { %v618_v17 = vmul.f32 %v529_v15, %v529_v15 }
 0x168   :  { %v582_v22 = vpop.f32.mrf.mxu3 }
 0x169   :  { %v680_v23 = vsel %vm360_vm1, %v618_v17, 0.0  ;;  %v583_v24 = vadd.f32 %v1601_v54, %v582_v22 }
 0x16a   :  { %732 = vadd.xlane.f32.xlu2 %v731_v18  ;;  %681 = vadd.xlane.f32.xlu0 %v680_v23 }
 0x16b   :  { %v636_v29 = vmul.f32 %v583_v24, %v583_v24  ;;  %v1755_v24 = vpop.xlane.xlu1 %932 }
 0x16c   :  { %v531_v30 = vpop.f32.mrf.mxu1 }
 0x16d   :  { %v532_v31 = vadd.f32 %v1601_v54, %v531_v30  ;;  %v734_v36 = vsel %vm360_vm1, %v636_v29, 0.0  ;;  %v952_v29 = vmul.f32 %v1741_v0, %v1604_v59 }
 0x16f   :  { %v619_v32 = vmul.f32 %v532_v31, %v532_v31 }
 0x170   :  { %v585_v35 = vpop.f32.mrf.mxu3 }
 0x171   :  { %v683_v38 = vsel %vm360_vm1, %v619_v32, 0.0  ;;  %v586_v41 = vadd.f32 %v1601_v54, %v585_v35 }
 0x172   :  { %684 = vadd.xlane.f32.xlu1 %v683_v38  ;;  %735 = vadd.xlane.f32.xlu0 %v734_v36 }
 0x173   :  { %v637_v42 = vmul.f32 %v586_v41, %v586_v41  ;;  %v1761_v41 = vpop.xlane.xlu2 %935 }
 0x174   :  { %v534_v47 = vpop.f32.mrf.mxu1 }
 0x175   :  { %v535_v48 = vadd.f32 %v1601_v54, %v534_v47  ;;  %v737_v53 = vsel %vm360_vm1, %v637_v42, 0.0 }
 0x177   :  { %v620_v52 = vmul.f32 %v535_v48, %v535_v48 }
 0x178   :  { %v588_v57 = vpop.f32.mrf.mxu3 }
 0x179   :  { %v686_v58 = vsel %vm360_vm1, %v620_v52, 0.0  ;;  %v589_v60 = vadd.f32 %v1601_v54, %v588_v57 }
 0x17a   :  { %687 = vadd.xlane.f32.xlu2 %v686_v58  ;;  %738 = vadd.xlane.f32.xlu1 %v737_v53  ;;  %v953_v53 = vmul.f32 %v1741_v0, %v1636_v34 }
 0x17b   :  { %v638_v1 = vmul.f32 %v589_v60, %v589_v60 }
 0x17c   :  { %v537_v3 = vpop.f32.mrf.mxu1 }
 0x17d   :  { %v538_v9 = vadd.f32 %v1601_v54, %v537_v3  ;;  %v646_v10 = vpop.xlane.xlu0 %645  ;;  %v740_v15 = vsel %vm360_vm1, %v638_v1, 0.0  ;;  %v971_v1 = vmul.f32 %v1741_v0, %v1702_v62 }
 0x17e   :  { %v989_v12 = vadd.f32 %v951_v2, %v646_v10 }
 0x17f   :  { %v621_v14 = vmul.f32 %v538_v9, %v538_v9 }
 0x180   :  { %v1027_v17 = vsub.f32 0.0, %v989_v12  ;;  %v591_v18 = vpop.f32.mrf.mxu3 }
 0x181   :  { %v689_v22 = vsel %vm360_vm1, %v621_v14, 0.0  ;;  %v592_v23 = vadd.f32 %v1601_v54, %v591_v18  ;;  %v954_v18 = vmul.f32 %v1741_v0, %v1642_v40  ;;  %v794_v40 = vld [vmem:[%s2012_s1 + $0x120] sm:$0xff] }
 0x182   :  { %1066 = vst.msk [vmem:[%s2014_s7] sm:$0xff] %vm1065_vm3, %v1027_v17  ;;  %741 = vadd.xlane.f32.xlu2 %v740_v15  ;;  %690 = vadd.xlane.f32.xlu0 %v689_v22 }
 0x183   :  { %v639_v26 = vmul.f32 %v592_v23, %v592_v23 }
 0x184   :  { %v540_v30 = vpop.f32.mrf.mxu1 }
 0x185   :  { %v541_v31 = vadd.f32 %v1601_v54, %v540_v30  ;;  %v649_v32 = vpop.xlane.xlu0 %648  ;;  %v743_v38 = vsel %vm360_vm1, %v639_v26, 0.0  ;;  %v972_v30 = vmul.f32 %v1741_v0, %v1708_v7 }
 0x186   :  { %v990_v36 = vadd.f32 %v952_v29, %v649_v32 }
 0x187   :  { %v622_v35 = vmul.f32 %v541_v31, %v541_v31 }
 0x188   :  { %v1028_v42 = vsub.f32 0.0, %v990_v36  ;;  %v594_v47 = vpop.f32.mrf.mxu3 }
 0x189   :  { %v692_v48 = vsel %vm360_vm1, %v622_v35, 0.0  ;;  %v595_v52 = vadd.f32 %v1601_v54, %v594_v47 }
 0x18a   :  { %1067 = vst.msk [vmem:[%s2014_s7 + $0x8] sm:$0xff] %vm1065_vm3, %v1028_v42  ;;  %693 = vadd.xlane.f32.xlu1 %v692_v48  ;;  %744 = vadd.xlane.f32.xlu0 %v743_v38 }
 0x18b   :  { %v640_v59 = vmul.f32 %v595_v52, %v595_v52  ;;  %v832_v52 = vmul.f32 %v794_v40, %v794_v40 }
 0x18c   :  { %v543_v57 = vpop.f32.mrf.mxu1 }
 0x18d   :  { %v544_v58 = vadd.f32 %v1601_v54, %v543_v57  ;;  %v652_v60 = vpop.xlane.xlu1 %651  ;;  %v746_v9 = vsel %vm360_vm1, %v640_v59, 0.0  ;;  %v955_v59 = vmul.f32 %v1741_v0, %v1614_v8 }
 0x18e   :  { %v991_v2 = vadd.f32 %v953_v53, %v652_v60 }
 0x18f   :  { %v623_v3 = vmul.f32 %v544_v58, %v544_v58 }
 0x190   :  { %v1029_v10 = vsub.f32 0.0, %v991_v2  ;;  %v597_v12 = vpop.f32.mrf.mxu3 }
 0x191   :  { %v695_v14 = vsel %vm360_vm1, %v623_v3, 0.0  ;;  %v598_v15 = vadd.f32 %v1601_v54, %v597_v12  ;;  %v706_v17 = vpop.xlane.xlu2 %705 }
 0x192   :  { %1068 = vst.msk [vmem:[%s2014_s7 + $0x10] sm:$0xff] %vm1065_vm3, %v1029_v10  ;;  %696 = vadd.xlane.f32.xlu2 %v695_v14  ;;  %747 = vadd.xlane.f32.xlu1 %v746_v9  ;;  %v1009_v34 = vadd.f32 %v971_v1, %v706_v17  ;;  %v943_v9 = vsel %vm834_vm2, %v832_v52, 0.0  ;;  %v973_v10 = vmul.f32 %v1741_v0, %v1684_v33 }
 0x193   :  { %v641_v62 = vmul.f32 %v598_v15, %v598_v15 }
 0x194   :  { %v546_v22 = vpop.f32.mrf.mxu1  ;;  %v1047_v23 = vsub.f32 0.0, %v1009_v34  ;;  %v795_v34 = vld [vmem:[%s2012_s1 + $0x128] sm:$0xff] }
 0x195   :  { %v547_v26 = vadd.f32 %v1601_v54, %v546_v22  ;;  %v655_v29 = vpop.xlane.xlu1 %654  ;;  %v749_v36 = vsel %vm360_vm1, %v641_v62, 0.0 }
 0x196   :  { %1086 = vst.msk [vmem:[%s2014_s7 + $0xa0] sm:$0xff] %vm1065_vm3, %v1047_v23  ;;  %v992_v31 = vadd.f32 %v954_v18, %v655_v29  ;;  %v956_v18 = vmul.f32 %v1741_v0, %v1648_v49 }
 0x197   :  { %v624_v32 = vmul.f32 %v547_v26, %v547_v26  ;;  %v833_v26 = vmul.f32 %v795_v34, %v795_v34 }
 0x198   :  { %v1030_v35 = vsub.f32 0.0, %v992_v31  ;;  %v600_v38 = vpop.f32.mrf.mxu3 }
 0x199   :  { %v698_v42 = vsel %vm360_vm1, %v624_v32, 0.0  ;;  %v601_v47 = vadd.f32 %v1601_v54, %v600_v38  ;;  %v709_v7 = vpop.xlane.xlu0 %708  ;;  %v974_v38 = vmul.f32 %v1741_v0, %v1713_v16  ;;  %v975_v16 = vmul.f32 %v1741_v0, %v1720_v27 }
 0x19a   :  { %1069 = vst.msk [vmem:[%s2014_s7 + $0x18] sm:$0xff] %vm1065_vm3, %v1030_v35  ;;  %750 = vadd.xlane.f32.xlu2 %v749_v36  ;;  %699 = vadd.xlane.f32.xlu0 %v698_v42  ;;  %v1010_v48 = vadd.f32 %v972_v30, %v709_v7  ;;  %v946_v36 = vsel %vm834_vm2, %v833_v26, 0.0  ;;  %v957_v35 = vmul.f32 %v1741_v0, %v1654_v56 }
 0x19b   :  { %v642_v57 = vmul.f32 %v601_v47, %v601_v47  ;;  %v958_v56 = vmul.f32 %v1741_v0, %v1623_v21  ;;  %v959_v21 = vmul.f32 %v1741_v0, %v1658_v63  ;;  %v976_v27 = vmul.f32 %v1741_v0, %v1695_v50 }
 0x19c   :  { %v549_v53 = vpop.f32.mrf.mxu1  ;;  %v1048_v58 = vsub.f32 0.0, %v1010_v48  ;;  %v960_v63 = vmul.f32 %v1741_v0, %v1664_v5  ;;  %v977_v50 = vmul.f32 %v1741_v0, %v1724_v37  ;;  %v961_v5 = vmul.f32 %v1741_v0, %v1640_v39 }
 0x19d   :  { %v550_v60 = vadd.f32 %v1601_v54, %v549_v53  ;;  %v658_v1 = vpop.xlane.xlu2 %657  ;;  %v752_v8 = vsel %vm360_vm1, %v642_v57, 0.0  ;;  %v978_v37 = vmul.f32 %v1741_v0, %v1730_v46  ;;  %v962_v39 = vmul.f32 %v1741_v0, %v1669_v13 }
 0x19e   :  { %v993_v2 = vadd.f32 %v955_v59, %v658_v1  ;;  %1087 = vst.msk [vmem:[%s2014_s7 + $0xa8] sm:$0xff] %vm1065_vm3, %v1048_v58  ;;  %v979_v46 = vmul.f32 %v1741_v0, %v1706_v6  ;;  %v963_v13 = vmul.f32 %v1741_v0, %v1676_v20  ;;  %v980_v6 = vmul.f32 %v1741_v0, %v1736_v61 }
 0x19f   :  { %v625_v3 = vmul.f32 %v550_v60, %v550_v60  ;;  %v964_v20 = vmul.f32 %v1741_v0, %v1652_v55  ;;  %v981_v61 = vmul.f32 %v1741_v0, %v1746_v11  ;;  %v965_v55 = vmul.f32 %v1741_v0, %v1680_v28 }
 0x1a0   :  { %v1031_v12 = vsub.f32 0.0, %v993_v2  ;;  %v982_v11 = vmul.f32 %v1741_v0, %v1718_v25  ;;  %v966_v28 = vmul.f32 %v1741_v0, %v1686_v43  ;;  %v983_v25 = vmul.f32 %v1741_v0, %v1755_v24 }
 0x1a1   :  { %v712_v14 = vpop.xlane.xlu1 %711  ;;  %v701_v15 = vsel %vm360_vm1, %v625_v3, 0.0  ;;  %v603_v17 = vpop.f32.mrf.mxu3  ;;  %v967_v43 = vmul.f32 %v1741_v0, %v1662_v4  ;;  %v984_v24 = vmul.f32 %v1741_v0, %v1761_v41  ;;  %v968_v4 = vmul.f32 %v1741_v0, %v1692_v45 }
 0x1a2   :  { %1070 = vst.msk [vmem:[%s2014_s7 + $0x20] sm:$0xff] %vm1065_vm3, %v1031_v12  ;;  %v1011_v62 = vadd.f32 %v973_v10, %v712_v14  ;;  %944 = vadd.xlane.f32.xlu2 %v943_v9  ;;  %702 = vadd.xlane.f32.xlu1 %v701_v15  ;;  %v604_v33 = vadd.f32 %v1601_v54, %v603_v17  ;;  %v793_v54 = vld [vmem:[%s2012_s1 + $0x118] sm:$0xff] }
 0x1a3   :  { %753 = vadd.xlane.f32.xlu0 %v752_v8  ;;  %v831_v49 = vmul.f32 %v793_v54, %v793_v54  ;;  %v985_v41 = vmul.f32 %v1741_v0, %v1728_v44  ;;  %v969_v45 = vmul.f32 %v1741_v0, %v1697_v51 }
 0x1a4   :  { %v1049_v22 = vsub.f32 0.0, %v1011_v62  ;;  %v643_v23 = vmul.f32 %v604_v33, %v604_v33 }
 0x1a5   :  { %v661_v29 = vpop.xlane.xlu2 %660  ;;  %v940_v48 = vsel %vm834_vm2, %v831_v49, 0.0 }
 0x1a6   :  { %1088 = vst.msk [vmem:[%s2014_s7 + $0xb0] sm:$0xff] %vm1065_vm3, %v1049_v22  ;;  %v994_v30 = vadd.f32 %v956_v18, %v661_v29  ;;  %v755_v31 = vsel %vm360_vm1, %v643_v23, 0.0 }
 0x1a8   :  { %v1032_v32 = vsub.f32 0.0, %v994_v30 }
 0x1aa   :  { %1071 = vst.msk [vmem:[%s2014_s7 + $0x28] sm:$0xff] %vm1065_vm3, %v1032_v32  ;;  %756 = vadd.xlane.f32.xlu1 %v755_v31 }
 0x1ab   :  { %947 = vadd.xlane.f32.xlu0 %v946_v36 }
 0x1ad   :  { %v715_v40 = vpop.xlane.xlu2 %714  ;;  %v664_v42 = vpop.xlane.xlu0 %663 }
 0x1ae   :  { %v1012_v47 = vadd.f32 %v974_v38, %v715_v40  ;;  %v995_v7 = vadd.f32 %v957_v35, %v664_v42 }
 0x1b0   :  { %v1050_v52 = vsub.f32 0.0, %v1012_v47  ;;  %v1033_v59 = vsub.f32 0.0, %v995_v7 }
 0x1b2   :  { %1089 = vst.msk [vmem:[%s2014_s7 + $0xb8] sm:$0xff] %vm1065_vm3, %v1050_v52  ;;  %941 = vadd.xlane.f32.xlu1 %v940_v48 }
 0x1b3   :  { %1072 = vst.msk [vmem:[%s2014_s7 + $0x30] sm:$0xff] %vm1065_vm3, %v1033_v59 }
 0x1b5   :  { %v667_v53 = vpop.xlane.xlu1 %666  ;;  %v718_v57 = vpop.xlane.xlu0 %717 }
 0x1b6   :  { %v996_v58 = vadd.f32 %v958_v56, %v667_v53  ;;  %v1013_v60 = vadd.f32 %v975_v16, %v718_v57 }
 0x1b8   :  { %v1034_v1 = vsub.f32 0.0, %v996_v58  ;;  %v1051_v2 = vsub.f32 0.0, %v1013_v60 }
 0x1ba   :  { %1073 = vst.msk [vmem:[%s2014_s7 + $0x38] sm:$0xff] %vm1065_vm3, %v1034_v1 }
 0x1bb   :  { %1090 = vst.msk [vmem:[%s2014_s7 + $0xc0] sm:$0xff] %vm1065_vm3, %v1051_v2 }
 0x1bd   :  { %v670_v3 = vpop.xlane.xlu2 %669  ;;  %v721_v9 = vpop.xlane.xlu1 %720 }
 0x1be   :  { %v997_v10 = vadd.f32 %v959_v21, %v670_v3  ;;  %v1014_v12 = vadd.f32 %v976_v27, %v721_v9 }
 0x1c0   :  { %v1035_v8 = vsub.f32 0.0, %v997_v10  ;;  %v1052_v14 = vsub.f32 0.0, %v1014_v12 }
 0x1c2   :  { %1074 = vst.msk [vmem:[%s2014_s7 + $0x40] sm:$0xff] %vm1065_vm3, %v1035_v8 }
 0x1c3   :  { %1091 = vst.msk [vmem:[%s2014_s7 + $0xc8] sm:$0xff] %vm1065_vm3, %v1052_v14 }
 0x1c5   :  { %v724_v15 = vpop.xlane.xlu2 %723  ;;  %v673_v17 = vpop.xlane.xlu0 %672 }
 0x1c6   :  { %v1015_v34 = vadd.f32 %v977_v50, %v724_v15  ;;  %v998_v62 = vadd.f32 %v960_v63, %v673_v17 }
 0x1c8   :  { %v1053_v33 = vsub.f32 0.0, %v1015_v34  ;;  %v1036_v18 = vsub.f32 0.0, %v998_v62 }
 0x1ca   :  { %1092 = vst.msk [vmem:[%s2014_s7 + $0xd0] sm:$0xff] %vm1065_vm3, %v1053_v33 }
 0x1cb   :  { %1075 = vst.msk [vmem:[%s2014_s7 + $0x48] sm:$0xff] %vm1065_vm3, %v1036_v18 }
 0x1cd   :  { %v676_v22 = vpop.xlane.xlu1 %675  ;;  %v727_v23 = vpop.xlane.xlu0 %726 }
 0x1ce   :  { %v999_v26 = vadd.f32 %v961_v5, %v676_v22  ;;  %v1016_v29 = vadd.f32 %v978_v37, %v727_v23 }
 0x1d0   :  { %v1037_v30 = vsub.f32 0.0, %v999_v26  ;;  %v1054_v31 = vsub.f32 0.0, %v1016_v29 }
 0x1d2   :  { %1076 = vst.msk [vmem:[%s2014_s7 + $0x50] sm:$0xff] %vm1065_vm3, %v1037_v30 }
 0x1d3   :  { %1093 = vst.msk [vmem:[%s2014_s7 + $0xd8] sm:$0xff] %vm1065_vm3, %v1054_v31 }
 0x1d5   :  { %v679_v32 = vpop.xlane.xlu2 %678  ;;  %v730_v36 = vpop.xlane.xlu1 %729 }
 0x1d6   :  { %v1000_v54 = vadd.f32 %v962_v39, %v679_v32  ;;  %v1017_v49 = vadd.f32 %v979_v46, %v730_v36  ;;  %v970_v39 = vmul.f32 %v1741_v0, %v1674_v19 }
 0x1d8   :  { %v1038_v35 = vsub.f32 0.0, %v1000_v54  ;;  %v1055_v38 = vsub.f32 0.0, %v1017_v49 }
 0x1da   :  { %1077 = vst.msk [vmem:[%s2014_s7 + $0x58] sm:$0xff] %vm1065_vm3, %v1038_v35 }
 0x1db   :  { %1094 = vst.msk [vmem:[%s2014_s7 + $0xe0] sm:$0xff] %vm1065_vm3, %v1055_v38 }
 0x1dd   :  { %v733_v40 = vpop.xlane.xlu2 %732  ;;  %v682_v42 = vpop.xlane.xlu0 %681 }
 0x1de   :  { %v1018_v47 = vadd.f32 %v980_v6, %v733_v40  ;;  %v1001_v7 = vadd.f32 %v963_v13, %v682_v42 }
 0x1e0   :  { %v1056_v48 = vsub.f32 0.0, %v1018_v47  ;;  %v1039_v52 = vsub.f32 0.0, %v1001_v7 }
 0x1e2   :  { %1095 = vst.msk [vmem:[%s2014_s7 + $0xe8] sm:$0xff] %vm1065_vm3, %v1056_v48 }
 0x1e3   :  { %1078 = vst.msk [vmem:[%s2014_s7 + $0x60] sm:$0xff] %vm1065_vm3, %v1039_v52 }
 0x1e5   :  { %v685_v59 = vpop.xlane.xlu1 %684  ;;  %v736_v56 = vpop.xlane.xlu0 %735 }
 0x1e6   :  { %v1002_v16 = vadd.f32 %v964_v20, %v685_v59  ;;  %v1019_v53 = vadd.f32 %v981_v61, %v736_v56 }
 0x1e8   :  { %v1040_v57 = vsub.f32 0.0, %v1002_v16  ;;  %v1057_v58 = vsub.f32 0.0, %v1019_v53 }
 0x1ea   :  { %1079 = vst.msk [vmem:[%s2014_s7 + $0x68] sm:$0xff] %vm1065_vm3, %v1040_v57 }
 0x1eb   :  { %1096 = vst.msk [vmem:[%s2014_s7 + $0xf0] sm:$0xff] %vm1065_vm3, %v1057_v58 }
 0x1ed   :  { %v688_v60 = vpop.xlane.xlu2 %687  ;;  %v739_v1 = vpop.xlane.xlu1 %738 }
 0x1ee   :  { %v1003_v2 = vadd.f32 %v965_v55, %v688_v60  ;;  %v1020_v21 = vadd.f32 %v982_v11, %v739_v1 }
 0x1f0   :  { %v1041_v27 = vsub.f32 0.0, %v1003_v2  ;;  %v1058_v3 = vsub.f32 0.0, %v1020_v21 }
 0x1f2   :  { %1080 = vst.msk [vmem:[%s2014_s7 + $0x70] sm:$0xff] %vm1065_vm3, %v1041_v27 }
 0x1f3   :  { %1097 = vst.msk [vmem:[%s2014_s7 + $0xf8] sm:$0xff] %vm1065_vm3, %v1058_v3 }
 0x1f5   :  { %v742_v9 = vpop.xlane.xlu2 %741  ;;  %v691_v10 = vpop.xlane.xlu0 %690 }
 0x1f6   :  { %v1021_v12 = vadd.f32 %v983_v25, %v742_v9  ;;  %v1004_v8 = vadd.f32 %v966_v28, %v691_v10 }
 0x1f8   :  { %v1059_v14 = vsub.f32 0.0, %v1021_v12  ;;  %v1042_v63 = vsub.f32 0.0, %v1004_v8 }
 0x1fa   :  { %1098 = vst.msk [vmem:[%s2014_s7 + $0x100] sm:$0xff] %vm1065_vm3, %v1059_v14 }
 0x1fb   :  { %1081 = vst.msk [vmem:[%s2014_s7 + $0x78] sm:$0xff] %vm1065_vm3, %v1042_v63 }
 0x1fd   :  { %v694_v50 = vpop.xlane.xlu1 %693  ;;  %v745_v15 = vpop.xlane.xlu0 %744 }
 0x1fe   :  { %v1005_v17 = vadd.f32 %v967_v43, %v694_v50  ;;  %v1022_v34 = vadd.f32 %v984_v24, %v745_v15 }
 0x200   :  { %v1043_v62 = vsub.f32 0.0, %v1005_v17  ;;  %v1060_v33 = vsub.f32 0.0, %v1022_v34 }
 0x202   :  { %1082 = vst.msk [vmem:[%s2014_s7 + $0x80] sm:$0xff] %vm1065_vm3, %v1043_v62 }
 0x203   :  { %1099 = vst.msk [vmem:[%s2014_s7 + $0x108] sm:$0xff] %vm1065_vm3, %v1060_v33 }
 0x205   :  { %v697_v18 = vpop.xlane.xlu2 %696  ;;  %v748_v5 = vpop.xlane.xlu1 %747 }
 0x206   :  { %v1006_v37 = vadd.f32 %v968_v4, %v697_v18  ;;  %v1023_v22 = vadd.f32 %v985_v41, %v748_v5 }
 0x208   :  { %v1044_v23 = vsub.f32 0.0, %v1006_v37  ;;  %v1061_v26 = vsub.f32 0.0, %v1023_v22 }
 0x20a   :  { %1083 = vst.msk [vmem:[%s2014_s7 + $0x88] sm:$0xff] %vm1065_vm3, %v1044_v23 }
 0x20b   :  { %1100 = vst.msk [vmem:[%s2014_s7 + $0x110] sm:$0xff] %vm1065_vm3, %v1061_v26 }
 0x20d   :  { %v751_v44 = vpop.xlane.xlu2 %750  ;;  %v700_v29 = vpop.xlane.xlu0 %699 }
 0x20e   :  { %v1007_v30 = vadd.f32 %v969_v45, %v700_v29 }
 0x210   :  { %v1045_v31 = vsub.f32 0.0, %v1007_v30 }
 0x212   :  { %1084 = vst.msk [vmem:[%s2014_s7 + $0x90] sm:$0xff] %vm1065_vm3, %v1045_v31 }
 0x215   :  { %v945_v46 = vpop.xlane.xlu2 %944  ;;  %v703_v32 = vpop.xlane.xlu1 %702 }
 0x216   :  { %v987_v36 = vmul.f32 %v1741_v0, %v945_v46  ;;  %v1008_v54 = vadd.f32 %v970_v39, %v703_v32  ;;  %v754_v49 = vpop.xlane.xlu0 %753 }
 0x218   :  { %v1046_v35 = vsub.f32 0.0, %v1008_v54  ;;  %v1025_v51 = vadd.f32 %v987_v36, %v754_v49 }
 0x21a   :  { %1085 = vst.msk [vmem:[%s2014_s7 + $0x98] sm:$0xff] %vm1065_vm3, %v1046_v35  ;;  %v1063_v38 = vsub.f32 0.0, %v1025_v51 }
 0x21c   :  { %1102 = vst.msk [vmem:[%s2014_s7 + $0x120] sm:$0xff] %vm1065_vm3, %v1063_v38 }
 0x21d   :  { %v757_v19 = vpop.xlane.xlu1 %756 }
 0x21e   :  { %v948_v13 = vpop.xlane.xlu0 %947 }
 0x21f   :  { %v988_v6 = vmul.f32 %v1741_v0, %v948_v13 }
 0x221   :  { %v1026_v40 = vadd.f32 %v988_v6, %v757_v19 }
 0x223   :  { %v1064_v42 = vsub.f32 0.0, %v1026_v40 }
 0x225   :  { %1103 = vst.msk [vmem:[%s2014_s7 + $0x128] sm:$0xff] %vm1065_vm3, %v1064_v42  ;;  %v942_v47 = vpop.xlane.xlu1 %941 }
 0x226   :  { %v986_v7 = vmul.f32 %v1741_v0, %v942_v47 }
 0x228   :  { %v1024_v48 = vadd.f32 %v986_v7, %v751_v44 }
 0x22a   :  { %v1062_v52 = vsub.f32 0.0, %v1024_v48 }
 0x22c   :  { %1101 = vst.msk [vmem:[%s2014_s7 + $0x118] sm:$0xff] %vm1065_vm3, %v1062_v52 }

</bundles_post_ra>
